<compile_context>
chip_gen: v6e
topology: v6e:2x2x1
jax: 0.10.0
libtpu: 0.0.40
codegen_flags: <defaults>
</compile_context>

<pallas_src>
import functools

import jax
import jax.numpy as jnp
from jax.experimental import pallas as pl
from jax.experimental.pallas import tpu as pltpu


def _pick_hw_tile(hw, c, itemsize, budget_bytes=2 * 1024 * 1024):
    """Largest lane-dense (multiple-of-128) tile that evenly divides HW and keeps
    a single (C, tile) buffer under ~2 MiB; falls back to a full-width block."""
    candidates = [t for t in (4096, 2048, 1024, 512, 256, 128) if hw % t == 0]
    for t in candidates:
        if c * t * itemsize <= budget_bytes:
            return t
    if candidates:
        return candidates[-1]          # smallest lane-dense tile that divides HW
    return hw                          # HW not a multiple of 128: single block


def _pool_mlp_kernel(x_ref, w1_ref, b1_ref, w2_ref, b2_ref, att_ref,
                     sum_sc, max_sc, *, inv_hw):
    # x_ref block: (1, C, THW); weights are full (untiled, resident) arrays.
    t = pl.program_id(1)

    @pl.when(t == 0)
    def _init():
        sum_sc[...] = jnp.zeros_like(sum_sc)
        max_sc[...] = jnp.full_like(max_sc, -jnp.inf)   # NOT zeros: all-neg channels

    x = x_ref[0].astype(jnp.float32)                            # (C, THW)
    sum_sc[...] += jnp.sum(x, axis=1, keepdims=True)            # lane (XLU) reduce
    max_sc[...] = jnp.maximum(max_sc[...], jnp.max(x, axis=1, keepdims=True))

    @pl.when(t == pl.num_programs(1) - 1)
    def _finalize():
        avg = sum_sc[...] * inv_hw                              # (C, 1) true-HW mean
        mx = max_sc[...]                                        # (C, 1)
        # Stack both pooled vectors as columns of one (C, 2) tile so avg/max
        # branches share a single fc1 / fc2 matmul pair.
        col = jax.lax.broadcasted_iota(jnp.int32, (avg.shape[0], 2), 1)
        pooled = jnp.where(col == 0, avg, mx)                   # (C, 2)
        h = jnp.dot(w1_ref[...], pooled,
                    preferred_element_type=jnp.float32) + b1_ref[...]   # (INT, 2)
        h = jnp.maximum(h, 0.0)                                 # relu
        s = jnp.dot(w2_ref[...], h,
                    preferred_element_type=jnp.float32) + b2_ref[...]   # (C, 2)
        s = jax.nn.sigmoid(s)
        att_ref[0] = jnp.sum(s, axis=1, keepdims=True)          # sig(avg)+sig(max)


def _scale_kernel(x_ref, att_ref, o_ref):
    # x block (1, C, THW), att block (1, C, 1) broadcast across lanes.
    x = x_ref[0].astype(jnp.float32)
    o_ref[0] = (x * att_ref[0]).astype(o_ref.dtype)


def cpca_channel_attention(x_nchw, w1, b1, w2, b2):
    """x_nchw: (B, C, H, W).
    w1: (INT, C) fc1 weight (1x1 conv squeezed), b1: (INT,)
    w2: (C, INT) fc2 weight, b2: (C,)
    Returns (B, C, H, W) with the same dtype as x_nchw."""
    B, C, H, W = x_nchw.shape
    INT = w1.shape[0]
    HW = H * W

    x = x_nchw.reshape(B, C, HW)                    # free reshape, no transpose

    w1c = jnp.asarray(w1, jnp.float32)              # (INT, C)
    b1c = jnp.asarray(b1, jnp.float32).reshape(INT, 1)
    w2c = jnp.asarray(w2, jnp.float32)              # (C, INT)
    b2c = jnp.asarray(b2, jnp.float32).reshape(C, 1)

    thw = _pick_hw_tile(HW, C, jnp.dtype(x.dtype).itemsize)
    n_tiles = HW // thw

    # Pass 1: streaming avg/max pooling over HW tiles + fused MLP -> att (B, C, 1).
    att = pl.pallas_call(
        functools.partial(_pool_mlp_kernel, inv_hw=1.0 / float(HW)),
        out_shape=jax.ShapeDtypeStruct((B, C, 1), jnp.float32),
        grid_spec=pltpu.PrefetchScalarGridSpec(
            num_scalar_prefetch=0,
            grid=(B, n_tiles),
            in_specs=[
                pl.BlockSpec((1, C, thw), lambda b, t: (b, 0, t)),
                pl.BlockSpec((INT, C), lambda b, t: (0, 0)),
                pl.BlockSpec((INT, 1), lambda b, t: (0, 0)),
                pl.BlockSpec((C, INT), lambda b, t: (0, 0)),
                pl.BlockSpec((C, 1), lambda b, t: (0, 0)),
            ],
            out_specs=pl.BlockSpec((1, C, 1), lambda b, t: (b, 0, 0)),
            scratch_shapes=[pltpu.VMEM((C, 1), jnp.float32),   # running sum
                            pltpu.VMEM((C, 1), jnp.float32)],  # running max
        ),
        compiler_params=pltpu.CompilerParams(
            dimension_semantics=("parallel", "arbitrary")),
    )(x, w1c, b1c, w2c, b2c)

    # Pass 2: lane-dense tiled scale, out = x * att (broadcast over HW lanes).
    out = pl.pallas_call(
        _scale_kernel,
        out_shape=jax.ShapeDtypeStruct((B, C, HW), x.dtype),
        grid_spec=pltpu.PrefetchScalarGridSpec(
            num_scalar_prefetch=0,
            grid=(B, n_tiles),
            in_specs=[
                pl.BlockSpec((1, C, thw), lambda b, t: (b, 0, t)),
                pl.BlockSpec((1, C, 1), lambda b, t: (b, 0, 0)),
            ],
            out_specs=pl.BlockSpec((1, C, thw), lambda b, t: (b, 0, t)),
        ),
        compiler_params=pltpu.CompilerParams(
            dimension_semantics=("parallel", "parallel")),
    )(x, att)

    return out.reshape(B, C, H, W)


def _reference(x_nchw, w1, b1, w2, b2):
    """Pure-JAX NCHW reference mirroring the PyTorch forward."""
    avg = jnp.mean(x_nchw, axis=(2, 3))             # (B, C)
    mx = jnp.max(x_nchw, axis=(2, 3))               # (B, C)

    def branch(p):                                  # p: (B, C)
        h = jnp.maximum(p @ w1.T + b1, 0.0)         # (B, INT)
        return jax.nn.sigmoid(h @ w2.T + b2)        # (B, C)

    att = branch(avg) + branch(mx)                  # (B, C)
    return x_nchw * att[:, :, None, None]


if __name__ == "__main__":
    B, C, H, W = 2, 4, 16, 16
    INT = 8  # internal_neurons

    key = jax.random.PRNGKey(0)
    kx, k1, k2, k3, k4 = jax.random.split(key, 5)
    x = jax.random.normal(kx, (B, C, H, W), dtype=jnp.float32)
    # fc1: Conv2d(C -> INT, 1x1) weights (INT, C, 1, 1) -> (INT, C); fc2: (C, INT)
    w1 = 0.3 * jax.random.normal(k1, (INT, C), dtype=jnp.float32)
    b1 = 0.1 * jax.random.normal(k2, (INT,), dtype=jnp.float32)
    w2 = 0.3 * jax.random.normal(k3, (C, INT), dtype=jnp.float32)
    b2 = 0.1 * jax.random.normal(k4, (C,), dtype=jnp.float32)

    out = jax.block_until_ready(cpca_channel_attention(x, w1, b1, w2, b2))
    ref = jax.block_until_ready(_reference(x, w1, b1, w2, b2))

    assert out.shape == (B, C, H, W)
    assert jnp.allclose(out, ref, atol=1e-5, rtol=1e-5), "mismatch vs reference"
    print("KERNEL_OK")
</pallas_src>

<mosaic_0001>
module attributes {stable_mosaic.version = 11 : i64} {
  func.func @_pool_mlp_kernel(%arg0: i32, %arg1: i32, %arg2: memref<1x4x256xf32, #tpu.memory_space<vmem>>, %arg3: memref<8x4xf32, #tpu.memory_space<vmem>>, %arg4: memref<8x1xf32, #tpu.memory_space<vmem>>, %arg5: memref<4x8xf32, #tpu.memory_space<vmem>>, %arg6: memref<4x1xf32, #tpu.memory_space<vmem>>, %arg7: memref<1x4x1xf32, #tpu.memory_space<vmem>>, %arg8: memref<4x1xf32, #tpu.memory_space<vmem>>, %arg9: memref<4x1xf32, #tpu.memory_space<vmem>>) attributes {dimension_semantics = [#tpu.dimension_semantics<parallel>, #tpu.dimension_semantics<arbitrary>], iteration_bounds = array<i64: 2, 1>, scalar_prefetch = 0 : i64, scratch_operands = 2 : i64, tpu.core_type = #tpu.core_type<tc>, window_params = [{transform_indices = @transform_0, window_bounds = array<i64: 1, 4, 256>}, {pipeline_mode = #tpu.pipeline_mode<synchronous>, transform_indices = @transform_1, window_bounds = array<i64: 8, 4>}, {pipeline_mode = #tpu.pipeline_mode<synchronous>, transform_indices = @transform_2, window_bounds = array<i64: 8, 1>}, {pipeline_mode = #tpu.pipeline_mode<synchronous>, transform_indices = @transform_3, window_bounds = array<i64: 4, 8>}, {pipeline_mode = #tpu.pipeline_mode<synchronous>, transform_indices = @transform_4, window_bounds = array<i64: 4, 1>}, {transform_indices = @transform_5, window_bounds = array<i64: 1, 4, 1>}]} {
    %c0_i32 = arith.constant 0 : i32
    %0 = arith.cmpi eq, %arg1, %c0_i32 : i32
    %1 = arith.extui %0 : i1 to i32
    %c0_i32_0 = arith.constant 0 : i32
    %2 = arith.cmpi ne, %1, %c0_i32_0 : i32
    scf.if %2 {
      %cst_14 = arith.constant 0.000000e+00 : f32
      %18 = vector.broadcast %cst_14 : f32 to vector<4x1xf32>
      %c0_15 = arith.constant 0 : index
      %c0_16 = arith.constant 0 : index
      %19 = vector.load %arg8[%c0_15, %c0_16] : memref<4x1xf32, #tpu.memory_space<vmem>>, vector<4x1xf32>
      tpu.vector_store %arg8[%c0_15, %c0_16], %18 {strides = array<i32>} : memref<4x1xf32, #tpu.memory_space<vmem>>, vector<4x1xf32>,
      %cst_17 = arith.constant 0xFF800000 : f32
      %20 = vector.broadcast %cst_17 : f32 to vector<4x1xf32>
      %c0_18 = arith.constant 0 : index
      %c0_19 = arith.constant 0 : index
      %21 = vector.load %arg9[%c0_18, %c0_19] : memref<4x1xf32, #tpu.memory_space<vmem>>, vector<4x1xf32>
      tpu.vector_store %arg9[%c0_18, %c0_19], %20 {strides = array<i32>} : memref<4x1xf32, #tpu.memory_space<vmem>>, vector<4x1xf32>,
    } else {
    }
    %c0 = arith.constant 0 : index
    %c0_1 = arith.constant 0 : index
    %c0_2 = arith.constant 0 : index
    %3 = vector.load %arg2[%c0, %c0_1, %c0_2] : memref<1x4x256xf32, #tpu.memory_space<vmem>>, vector<1x4x256xf32>
    %4 = vector.shape_cast %3 : vector<1x4x256xf32> to vector<4x256xf32>
    %c0_3 = arith.constant 0 : index
    %c0_4 = arith.constant 0 : index
    %5 = vector.load %arg8[%c0_3, %c0_4] : memref<4x1xf32, #tpu.memory_space<vmem>>, vector<4x1xf32>
    %cst = arith.constant dense<0.000000e+00> : vector<4xf32>
    %6 = vector.multi_reduction <add>, %4, %cst [1] : vector<4x256xf32> to vector<4xf32>
    %7 = vector.shape_cast %6 : vector<4xf32> to vector<4x1xf32>
    %8 = arith.addf %5, %7 : vector<4x1xf32>
    %c0_5 = arith.constant 0 : index
    %c0_6 = arith.constant 0 : index
    %9 = vector.load %arg8[%c0_5, %c0_6] : memref<4x1xf32, #tpu.memory_space<vmem>>, vector<4x1xf32>
    tpu.vector_store %arg8[%c0_5, %c0_6], %8 {strides = array<i32>} : memref<4x1xf32, #tpu.memory_space<vmem>>, vector<4x1xf32>,
    %c0_7 = arith.constant 0 : index
    %c0_8 = arith.constant 0 : index
    %10 = vector.load %arg9[%c0_7, %c0_8] : memref<4x1xf32, #tpu.memory_space<vmem>>, vector<4x1xf32>
    %cst_9 = arith.constant dense<0xFF800000> : vector<4xf32>
    %11 = vector.multi_reduction <maximumf>, %4, %cst_9 [1] : vector<4x256xf32> to vector<4xf32>
    %12 = vector.shape_cast %11 : vector<4xf32> to vector<4x1xf32>
    %13 = arith.maximumf %10, %12 : vector<4x1xf32>
    %c0_10 = arith.constant 0 : index
    %c0_11 = arith.constant 0 : index
    %14 = vector.load %arg9[%c0_10, %c0_11] : memref<4x1xf32, #tpu.memory_space<vmem>>, vector<4x1xf32>
    tpu.vector_store %arg9[%c0_10, %c0_11], %13 {strides = array<i32>} : memref<4x1xf32, #tpu.memory_space<vmem>>, vector<4x1xf32>,
    %c0_i32_12 = arith.constant 0 : i32
    %15 = arith.cmpi eq, %arg1, %c0_i32_12 : i32
    %16 = arith.extui %15 : i1 to i32
    %c0_i32_13 = arith.constant 0 : i32
    %17 = arith.cmpi ne, %16, %c0_i32_13 : i32
    scf.if %17 {
      %c0_14 = arith.constant 0 : index
      %c0_15 = arith.constant 0 : index
      %18 = vector.load %arg8[%c0_14, %c0_15] : memref<4x1xf32, #tpu.memory_space<vmem>>, vector<4x1xf32>
      %cst_16 = arith.constant 3.906250e-03 : f32
      %19 = vector.broadcast %cst_16 : f32 to vector<4x1xf32>
      %20 = arith.mulf %18, %19 : vector<4x1xf32>
      %c0_17 = arith.constant 0 : index
      %c0_18 = arith.constant 0 : index
      %21 = vector.load %arg9[%c0_17, %c0_18] : memref<4x1xf32, #tpu.memory_space<vmem>>, vector<4x1xf32>
      %22 = tpu.iota {dimensions = array<i32: 1>} : vector<4x2xi32>
      %c0_i32_19 = arith.constant 0 : i32
      %23 = vector.broadcast %c0_i32_19 : i32 to vector<4x2xi32>
      %24 = arith.cmpi eq, %22, %23 : vector<4x2xi32>
      %25 = vector.shape_cast %20 : vector<4x1xf32> to vector<4x1xf32>
      %26 = vector.broadcast %25 : vector<4x1xf32> to vector<4x2xf32>
      %27 = vector.shape_cast %21 : vector<4x1xf32> to vector<4x1xf32>
      %28 = vector.broadcast %27 : vector<4x1xf32> to vector<4x2xf32>
      %29 = arith.select %24, %26, %28 : vector<4x2xi1>, vector<4x2xf32>
      %c0_20 = arith.constant 0 : index
      %c0_21 = arith.constant 0 : index
      %30 = vector.load %arg3[%c0_20, %c0_21] : memref<8x4xf32, #tpu.memory_space<vmem>>, vector<8x4xf32>
      %cst_22 = arith.constant dense<0.000000e+00> : vector<8x2xf32>
      %31 = tpu.matmul %30, %29, %cst_22 {dimension_numbers = #tpu.dot_dimension_numbers<[1], [0], [0], [1], [0, 0, 1, 1], [], []>} : vector<8x4xf32>, vector<4x2xf32>, vector<8x2xf32> -> vector<8x2xf32>
      %c0_23 = arith.constant 0 : index
      %c0_24 = arith.constant 0 : index
      %32 = vector.load %arg4[%c0_23, %c0_24] : memref<8x1xf32, #tpu.memory_space<vmem>>, vector<8x1xf32>
      %33 = vector.broadcast %32 : vector<8x1xf32> to vector<8x2xf32>
      %34 = arith.addf %31, %33 : vector<8x2xf32>
      %cst_25 = arith.constant 0.000000e+00 : f32
      %35 = vector.broadcast %cst_25 : f32 to vector<8x2xf32>
      %36 = arith.maximumf %34, %35 : vector<8x2xf32>
      %c0_26 = arith.constant 0 : index
      %c0_27 = arith.constant 0 : index
      %37 = vector.load %arg5[%c0_26, %c0_27] : memref<4x8xf32, #tpu.memory_space<vmem>>, vector<4x8xf32>
      %cst_28 = arith.constant dense<0.000000e+00> : vector<4x2xf32>
      %38 = tpu.matmul %37, %36, %cst_28 {dimension_numbers = #tpu.dot_dimension_numbers<[1], [0], [0], [1], [0, 0, 1, 1], [], []>} : vector<4x8xf32>, vector<8x2xf32>, vector<4x2xf32> -> vector<4x2xf32>
      %c0_29 = arith.constant 0 : index
      %c0_30 = arith.constant 0 : index
      %39 = vector.load %arg6[%c0_29, %c0_30] : memref<4x1xf32, #tpu.memory_space<vmem>>, vector<4x1xf32>
      %40 = vector.broadcast %39 : vector<4x1xf32> to vector<4x2xf32>
      %41 = arith.addf %38, %40 : vector<4x2xf32>
      %42 = arith.negf %41 : vector<4x2xf32>
      %43 = math.exp %42 : vector<4x2xf32>
      %cst_31 = arith.constant 1.000000e+00 : f32
      %44 = vector.broadcast %cst_31 : f32 to vector<4x2xf32>
      %45 = arith.addf %44, %43 : vector<4x2xf32>
      %46 = arith.divf %44, %45 : vector<4x2xf32>
      %cst_32 = arith.constant dense<0.000000e+00> : vector<4xf32>
      %47 = vector.multi_reduction <add>, %46, %cst_32 [1] : vector<4x2xf32> to vector<4xf32>
      %48 = vector.shape_cast %47 : vector<4xf32> to vector<4x1xf32>
      %c0_33 = arith.constant 0 : index
      %c0_34 = arith.constant 0 : index
      %c0_35 = arith.constant 0 : index
      %49 = vector.load %arg7[%c0_33, %c0_34, %c0_35] : memref<1x4x1xf32, #tpu.memory_space<vmem>>, vector<1x4x1xf32>
      %50 = vector.shape_cast %49 : vector<1x4x1xf32> to vector<4x1xf32>
      %51 = vector.shape_cast %48 : vector<4x1xf32> to vector<1x4x1xf32>
      tpu.vector_store %arg7[%c0_33, %c0_34, %c0_35], %51 {strides = array<i32>} : memref<1x4x1xf32, #tpu.memory_space<vmem>>, vector<1x4x1xf32>,
    } else {
    }
    return
  }
  func.func @transform_0(%arg0: i32, %arg1: i32) -> (i32, i32, i32) {
    %c0_i32 = arith.constant 0 : i32
    %c0_i32_0 = arith.constant 0 : i32
    return %arg0, %c0_i32, %arg1 : i32, i32, i32
  }
  func.func @transform_1(%arg0: i32, %arg1: i32) -> (i32, i32) {
    %c0_i32 = arith.constant 0 : i32
    %c0_i32_0 = arith.constant 0 : i32
    %c0_i32_1 = arith.constant 0 : i32
    return %c0_i32, %c0_i32_0 : i32, i32
  }
  func.func @transform_2(%arg0: i32, %arg1: i32) -> (i32, i32) {
    %c0_i32 = arith.constant 0 : i32
    %c0_i32_0 = arith.constant 0 : i32
    %c0_i32_1 = arith.constant 0 : i32
    return %c0_i32, %c0_i32_0 : i32, i32
  }
  func.func @transform_3(%arg0: i32, %arg1: i32) -> (i32, i32) {
    %c0_i32 = arith.constant 0 : i32
    %c0_i32_0 = arith.constant 0 : i32
    %c0_i32_1 = arith.constant 0 : i32
    return %c0_i32, %c0_i32_0 : i32, i32
  }
  func.func @transform_4(%arg0: i32, %arg1: i32) -> (i32, i32) {
    %c0_i32 = arith.constant 0 : i32
    %c0_i32_0 = arith.constant 0 : i32
    %c0_i32_1 = arith.constant 0 : i32
    return %c0_i32, %c0_i32_0 : i32, i32
  }
  func.func @transform_5(%arg0: i32, %arg1: i32) -> (i32, i32, i32) {
    %c0_i32 = arith.constant 0 : i32
    %c0_i32_0 = arith.constant 0 : i32
    %c0_i32_1 = arith.constant 0 : i32
    return %arg0, %c0_i32, %c0_i32_0 : i32, i32, i32
  }
}

</mosaic_0001>

<bundles_post_ra>
// kernel: tpu_custom_call.1
= control target key start
LH: loop header
LB: loop body
LE: loop exit
PB: predicated region body
PF: predicated region fallthrough
CT: control target
= control target key end

     0   :  { %s666_s18 = smov 0   ;;  %s668_s19 = smov 0   ;;  %s725_s0 = inlined_call_operand.vmem [shape: f32[2,4,256], index: 0, kind: input, shape index: {}]   ;;  %s726_s1 = inlined_call_operand.vmem [shape: f32[8,4], index: 1, kind: input, shape index: {}]   ;;  %s727_s2 = inlined_call_operand.vmem [shape: f32[8,1], index: 2, kind: input, shape index: {}]   ;;  %s728_s3 = inlined_call_operand.vmem [shape: f32[4,8], index: 3, kind: input, shape index: {}]   ;;  %s729_s4 = inlined_call_operand.vmem [shape: f32[4,1], index: 4, kind: input, shape index: {}]   ;;  %s730_s5 = inlined_call_operand.vmem [shape: f32[2,4,1], index: 5, kind: output, shape index: {}]  }
   0x1   :  { %s670_s20 = smov 0  }
   0x2 LB: > { %s27_s21 = sadd.s32 1, %s626_s19  ;;  %p548_p0 = scmp.ge.s32.totalorder %s630_s20, 1  ;;  %s630_s20 = sphi %s670_s20, %s15_s20   ;;  %s626_s19 = sphi %s668_s19, %s732_s19   ;;  %s622_s18 = sphi %s666_s18, %s731_s18  }
   0x3   : > { %p29_p1 = scmp.ge.s32.totalorder %s27_s21, 2  ;;  %p206_p2 = scmp.lt.s32.totalorder %s630_s20, 3 }
   0x5   : > { %s734_s21 = smov (%p29_p1, %s27_s21), 0  ;;  %p207_p3 = pnand %p548_p0, %p206_p2 }
   0x6   : > { %p238_p4 = scmp.lt.s32.totalorder (!%p207_p3), %s622_s18, 1 }
   0x7   : > { %210 = sbr.rel (%p207_p3) target bundleno = 866 (0x362), region = 40 }
   0xc   : > { %vm255_vm0 = vcmask 3072   ;;  %v632_v0 = vmov 0.0   ;;  %s736_s18 = smov (!%p238_p4, %s622_s18), 1  ;;  %vm263_vm1 = vcmask 1043456   ;;  %v633_v9 = vmov -inf   ;;  %v301_v20 = vld [vmem:[%s727_s2] sm:$0xff] }
   0xd   : > { %256 = vst.msk [vmem:[#allocation2] sm:$0xf] %vm255_vm0, %v632_v0  ;;  %563 = vmatprep.subr.mxu0 %v632_v0  ;;  %568 = vmatprep.subr.mxu1 %v632_v0  ;;  %s558_s22 = sshll.u32 %s736_s18, 3  ;;  %257 = vst.msk [vmem:[#allocation3] sm:$0xf] %vm255_vm0, %v633_v9  ;;  %v634_v10 = vmov 0   ;;  %v286_v22 = vlaneseq }
   0xe   : > { %s245_s25 = scalar_lea.vmem %s725_s0, %s558_s22  ;;  %601 = vset.pattern.permute.xlu1 %v634_v10  ;;  %602 = vset.pattern.permute.xlu0 %v634_v10  ;;  %vm635_vm2 = vmmov 0   ;;  %v386_v21 = vld [vmem:[%s729_s4] sm:$0xf]  ;;  %vm307_vm4 = vcmask 31744   ;;  %vm392_vm5 = vcmask 64512   ;;  %vm472_vm6 = vcmask 11264  }
   0xf   : > { %v258_v1 = vld [vmem:[%s245_s25] sm:$0xff]  ;;  %565 = vmatprep.mubr.msk.f32.mxu0 %vm635_vm2, %v632_v0  ;;  %570 = vmatprep.mubr.msk.f32.mxu1 %vm635_vm2, %v632_v0  ;;  %v287_v23 = vand.u32 127, %v286_v22  ;;  %s551_s9 = sshll.u32 %s736_s18, 2 }
  0x10   : > { %v261_v2 = vcombine.high %v258_v1, %v258_v1  ;;  %v264_v3 = vsel %vm263_vm1, %v258_v1, 0.0  ;;  %v273_v5 = vsel %vm263_vm1, %v258_v1, -inf  ;;  %v300_v26 = vld [vmem:[%s726_s1] sm:$0xff]  ;;  %s250_s12 = scalar_lea.vmem %s730_s5, %s551_s9 }
  0x11   : > { %vm288_vm3 = vcmp.eq.s32.totalorder %v287_v23, 0  ;;  %v385_v33 = vld [vmem:[%s728_s3] sm:$0xf] }
  0x12   : > { %v265_v4 = vsel %vm263_vm1, %v261_v2, 0.0  ;;  %v274_v6 = vsel %vm263_vm1, %v261_v2, -inf }
  0x13   : > { %v266_v7 = vadd.f32 %v265_v4, %v264_v3  ;;  %v275_v8 = vmax.f32 %v273_v5, %v274_v6 }
  0x14   : > { %v259_v11 = vld [vmem:[#allocation2] sm:$0xf]  ;;  %v272_v14 = vld [vmem:[#allocation3] sm:$0xf] }
  0x15   : > { %267 = vadd.xlane.f32.xlu0 %v266_v7 }
  0x19   : > { %276 = vmax.xlane.f32.xlu0 %v275_v8 }
  0x2f   : > { %304 = vperm.xlu0 %602, %v301_v20  }
  0x9e   : > { %v268_v12 = vpop.xlane.xlu0 %267 }
  0x9f   : > { %v269_v13 = vadd.f32 %v268_v12, %v259_v11 }
  0xa1   : > { %271 = vst.msk [vmem:[#allocation2] sm:$0xf] %vm255_vm0, %v269_v13 }
  0xa2   : > { %v277_v15 = vpop.xlane.xlu0 %276 }
  0xa3   : > { %v278_v16 = vmax.f32 %v272_v14, %v277_v15 }
  0xa5   : > { %279 = vst.msk [vmem:[#allocation3] sm:$0xf] %vm255_vm0, %v278_v16 }
  0xa8   : > { %v283_v17 = vld [vmem:[#allocation2] sm:$0xf] }
  0xa9   : > { %v284_v18 = vmul.f32 0.00390625, %v283_v17 }
  0xaa   : > { %v305_v28 = vpop.permute.xlu0 %304 }
  0xab   : > { %291 = vperm.xlu1 %601, %v284_v18  }
  0xac   : > { %v285_v19 = vld [vmem:[#allocation3] sm:$0xf] }
  0xaf   : > { %296 = vperm.xlu1 %601, %v285_v19  }
  0xb3   : > { %389 = vperm.xlu1 %601, %v386_v21  }
 0x126   : > { %v292_v24 = vpop.permute.xlu1 %291 }
 0x12a   : > { %v297_v25 = vpop.permute.xlu1 %296 }
 0x12b   : > { %v299_v27 = vsel %vm288_vm3, %v292_v24, %v297_v25 }
 0x12c   : > { %564 = vmatpush3.msk.msra.mxu0 %vm263_vm1, %v299_v27 }
 0x12d   : > { %566 = vmatmul.mubr.msk.f32.vlgmr.msra.gmra.mxu0 %vm307_vm4, %v300_v26 }
 0x12e   : > { %v390_v34 = vpop.permute.xlu1 %389 }
 0x1ed   : > { %v380_v29 = vpop.f32.mrf.mxu0 }
 0x1ee   : > { %v381_v30 = vadd.f32 %v380_v29, %v305_v28 }
 0x1ef   : > { %v567_v31 = vpop.f32.mrf.mxu0 }
 0x1f0   : > { %v384_v32 = vmax.f32 %v381_v30, 0.0 }
 0x1f2   : > { %569 = vmatpush3.msra.mxu1 %v384_v32 }
 0x1f3   : > { %571 = vmatmul.mubr.msk.f32.vlgmr.msra.gmra.mxu1 %vm392_vm5, %v385_v33 }
 0x2b3   : > { %v462_v35 = vpop.f32.mrf.mxu1 }
 0x2b4   : > { %v463_v36 = vadd.f32 %v462_v35, %v390_v34 }
 0x2b5   : > { %v572_v37 = vpop.f32.mrf.mxu1 }
 0x2b6   : > { %v555_v38 = vmul.f32 -1.442695, %v463_v36 }
 0x2b8   : > { %604 = vpow2.f32 %v555_v38 }
 0x2c5   : > { %v605_v39 = vpop.eup %604 }
 0x2c6   : > { %v469_v40 = vadd.f32 1.0, %v605_v39 }
 0x2c8   : > { %606 = vrcp.f32 %v469_v40 }
 0x2d5   : > { %v607_v41 = vpop.eup %606 }
 0x2d6   : > { %v473_v42 = vsel %vm472_vm6, %v607_v41, 0.0 }
 0x2d7   : > { %474 = vadd.xlane.f32.xlu1 %v473_v42 }
 0x360   : > { %v475_v43 = vpop.xlane.xlu1 %474 }
 0x361   : > { %476 = vst.msk [vmem:[%s250_s12] sm:$0xf] %vm255_vm0, %v475_v43 }
 0x362 PF: > { %s15_s20 = sadd.s32 1, %s630_s20   ;;  %s731_s18 = smov %s626_s19 }
 0x363   : > { %p12_p5 = scmp.ge.s32.totalorder %s15_s20, 4   ;;  %s732_s19 = smov %s734_s21 }
 0x365   :  { %14 = sbr.rel (!%p12_p5) target bundleno = 2 (0x2), region = 78 }

</bundles_post_ra>
